<compile_context>
chip_gen: v7x
topology: tpu7x:2x2x1
jax: 0.10.0
libtpu: 0.0.40
codegen_flags: <defaults>
</compile_context>

<pallas_src>
import jax
import jax.numpy as jnp
from jax.experimental import pallas as pl
from jax.experimental.pallas import tpu as pltpu


def _round_up(a, b):
    return ((a + b - 1) // b) * b


def tcn_kernel(x_ref, w_ref, scale_ref, shift_ref, o_ref):
    # One deep matmul per M tile: (TILE_M, Kc_p) @ (Kc_p, C_out_p), f32 acc.
    acc = jnp.dot(x_ref[...], w_ref[...], preferred_element_type=jnp.float32)
    # Fused inference BatchNorm; conv bias already folded into shift.
    o_ref[...] = (acc * scale_ref[...] + shift_ref[...]).astype(o_ref.dtype)


def unit_tcn_forward(x, conv_w, conv_b, bn_gamma, bn_beta, bn_mean, bn_var,
                     *, kernel_size=9, stride=1, dilation=1, eps=1e-5,
                     compute_dtype=jnp.float32, tile_m=512):
    """x: (N, C_in, T, V) float32.  Returns (N, C_out, T_out, V) float32."""
    N, C_in, T, V = x.shape
    C_out = conv_w.shape[0]
    K = kernel_size
    pad = (K + (K - 1) * (dilation - 1) - 1) // 2
    eff_k = (K - 1) * dilation + 1
    T_pad = T + 2 * pad
    T_out = (T_pad - eff_k) // stride + 1
    M = N * T_out * V
    Kc = K * C_in

    # ---- host glue: im2col with K folded into the contraction ----
    x_p = jnp.pad(x, ((0, 0), (0, 0), (pad, pad), (0, 0)))
    taps = []
    for k in range(K):
        start = k * dilation
        sl = x_p[:, :, start:start + (T_out - 1) * stride + 1:stride, :]  # (N,C_in,T_out,V)
        sl = jnp.transpose(sl, (0, 2, 3, 1)).reshape(M, C_in)             # (M, C_in)
        taps.append(sl)
    x_col = jnp.concatenate(taps, axis=-1)                                # (M, K*C_in)

    # weight (C_out, C_in, K, 1) -> (K*C_in, C_out), matching x_col column order.
    w_col = jnp.transpose(conv_w[:, :, :, 0], (2, 1, 0)).reshape(Kc, C_out)

    # Fold conv bias + inference BatchNorm into one per-channel scale/shift.
    scale = bn_gamma / jnp.sqrt(bn_var + eps)
    shift = bn_beta + (conv_b - bn_mean) * scale

    # Lane-dense / aligned tiles: pad contraction dim and C_out to 128 multiples.
    Kc_p = _round_up(Kc, 128)
    C_out_p = _round_up(C_out, 128)
    if Kc_p != Kc:
        x_col = jnp.pad(x_col, ((0, 0), (0, Kc_p - Kc)))
        w_col = jnp.pad(w_col, ((0, Kc_p - Kc), (0, 0)))
    if C_out_p != C_out:
        w_col = jnp.pad(w_col, ((0, 0), (0, C_out_p - C_out)))
        scale = jnp.pad(scale, (0, C_out_p - C_out))
        shift = jnp.pad(shift, (0, C_out_p - C_out))

    # Tile M; pad M so the grid divides evenly.
    if M < tile_m:
        tile_m = _round_up(M, 8)
    M_pad = _round_up(M, tile_m)
    if M_pad != M:
        x_col = jnp.pad(x_col, ((0, M_pad - M), (0, 0)))

    x_col = x_col.astype(compute_dtype)
    w_col = w_col.astype(compute_dtype)
    scale2 = scale.reshape(1, C_out_p).astype(jnp.float32)
    shift2 = shift.reshape(1, C_out_p).astype(jnp.float32)

    grid = (M_pad // tile_m,)
    out_flat = pl.pallas_call(
        tcn_kernel,
        out_shape=jax.ShapeDtypeStruct((M_pad, C_out_p), jnp.float32),
        grid=grid,
        in_specs=[
            pl.BlockSpec((tile_m, Kc_p), lambda m: (m, 0)),
            pl.BlockSpec((Kc_p, C_out_p), lambda m: (0, 0)),
            pl.BlockSpec((1, C_out_p), lambda m: (0, 0)),
            pl.BlockSpec((1, C_out_p), lambda m: (0, 0)),
        ],
        out_specs=pl.BlockSpec((tile_m, C_out_p), lambda m: (m, 0)),
        compiler_params=pltpu.CompilerParams(
            dimension_semantics=("parallel",)),
    )(x_col, w_col, scale2, shift2)

    # Strip padding, (M, C_out) -> (N, T_out, V, C_out) -> NCHW.
    out = out_flat[:M, :C_out].reshape(N, T_out, V, C_out).transpose(0, 3, 1, 2)
    # TODO(synk): nn.Dropout(p=0) / eval mode is identity; not a kernel.
    return out


def reference_forward(x, conv_w, conv_b, bn_gamma, bn_beta, bn_mean, bn_var,
                      *, kernel_size=9, stride=1, dilation=1, eps=1e-5):
    """Plain-JAX reference (same math), for correctness check."""
    N, C_in, T, V = x.shape
    C_out = conv_w.shape[0]
    K = kernel_size
    pad = (K + (K - 1) * (dilation - 1) - 1) // 2
    eff_k = (K - 1) * dilation + 1
    T_out = (T + 2 * pad - eff_k) // stride + 1
    x_p = jnp.pad(x, ((0, 0), (0, 0), (pad, pad), (0, 0)))
    acc = jnp.zeros((N, C_out, T_out, V), jnp.float32)
    for k in range(K):
        start = k * dilation
        sl = x_p[:, :, start:start + (T_out - 1) * stride + 1:stride, :]
        acc = acc + jnp.einsum('ncTv,oc->noTv', sl, conv_w[:, :, k, 0])
    acc = acc + conv_b[None, :, None, None]
    scale = bn_gamma / jnp.sqrt(bn_var + eps)
    shift = bn_beta - bn_mean * scale
    return acc * scale[None, :, None, None] + shift[None, :, None, None]


if __name__ == "__main__":
    key = jax.random.PRNGKey(0)
    N, C_in, C_out, T, V = 2, 4, 8, 16, 16
    K, stride, dilation = 9, 1, 1

    k_x, k_w = jax.random.split(key)
    x = jax.random.normal(k_x, (N, C_in, T, V), jnp.float32)

    # conv_init: kaiming normal, fan_out = C_out * K * 1 ; bias = 0
    fan_out = C_out * K * 1
    std = (2.0 / fan_out) ** 0.5
    conv_w = std * jax.random.normal(k_w, (C_out, C_in, K, 1), jnp.float32)
    conv_b = jnp.zeros((C_out,), jnp.float32)

    # bn_init(bn, 1): weight=1, bias=0; fresh running stats mean=0, var=1
    bn_gamma = jnp.ones((C_out,), jnp.float32)
    bn_beta = jnp.zeros((C_out,), jnp.float32)
    bn_mean = jnp.zeros((C_out,), jnp.float32)
    bn_var = jnp.ones((C_out,), jnp.float32)

    ref = reference_forward(x, conv_w, conv_b, bn_gamma, bn_beta, bn_mean,
                            bn_var, kernel_size=K, stride=stride,
                            dilation=dilation)

    # f32 MXU inputs: tight tolerance against the reference.
    out = unit_tcn_forward(x, conv_w, conv_b, bn_gamma, bn_beta, bn_mean,
                           bn_var, kernel_size=K, stride=stride,
                           dilation=dilation, compute_dtype=jnp.float32)
    out = jax.block_until_ready(out)
    assert out.shape == (N, C_out, T, V), out.shape
    assert jnp.allclose(out, ref, atol=1e-4, rtol=1e-4), \
        float(jnp.max(jnp.abs(out - ref)))

    print("KERNEL_OK")
</pallas_src>

<mosaic_0001>
module attributes {stable_mosaic.version = 11 : i64} {
  func.func @tcn_kernel(%arg0: i32, %arg1: memref<512x128xf32, #tpu.memory_space<vmem>>, %arg2: memref<128x128xf32, #tpu.memory_space<vmem>>, %arg3: memref<1x128xf32, #tpu.memory_space<vmem>>, %arg4: memref<1x128xf32, #tpu.memory_space<vmem>>, %arg5: memref<512x128xf32, #tpu.memory_space<vmem>>) attributes {dimension_semantics = [#tpu.dimension_semantics<parallel>], iteration_bounds = array<i64: 1>, scalar_prefetch = 0 : i64, scratch_operands = 0 : i64, tpu.core_type = #tpu.core_type<tc>, window_params = [{transform_indices = @transform_0, window_bounds = array<i64: 512, 128>}, {pipeline_mode = #tpu.pipeline_mode<synchronous>, transform_indices = @transform_1, window_bounds = array<i64: 128, 128>}, {pipeline_mode = #tpu.pipeline_mode<synchronous>, transform_indices = @transform_2, window_bounds = array<i64: 1, 128>}, {pipeline_mode = #tpu.pipeline_mode<synchronous>, transform_indices = @transform_3, window_bounds = array<i64: 1, 128>}, {transform_indices = @transform_4, window_bounds = array<i64: 512, 128>}]} {
    %c0 = arith.constant 0 : index
    %c0_0 = arith.constant 0 : index
    %0 = vector.load %arg1[%c0, %c0_0] : memref<512x128xf32, #tpu.memory_space<vmem>>, vector<512x128xf32>
    %c0_1 = arith.constant 0 : index
    %c0_2 = arith.constant 0 : index
    %1 = vector.load %arg2[%c0_1, %c0_2] : memref<128x128xf32, #tpu.memory_space<vmem>>, vector<128x128xf32>
    %cst = arith.constant dense<0.000000e+00> : vector<512x128xf32>
    %2 = tpu.matmul %0, %1, %cst {dimension_numbers = #tpu.dot_dimension_numbers<[1], [0], [0], [1], [0, 0, 1, 1], [], []>} : vector<512x128xf32>, vector<128x128xf32>, vector<512x128xf32> -> vector<512x128xf32>
    %c0_3 = arith.constant 0 : index
    %c0_4 = arith.constant 0 : index
    %3 = vector.load %arg3[%c0_3, %c0_4] : memref<1x128xf32, #tpu.memory_space<vmem>>, vector<1x128xf32>
    %4 = vector.broadcast %3 : vector<1x128xf32> to vector<512x128xf32>
    %5 = arith.mulf %2, %4 : vector<512x128xf32>
    %c0_5 = arith.constant 0 : index
    %c0_6 = arith.constant 0 : index
    %6 = vector.load %arg4[%c0_5, %c0_6] : memref<1x128xf32, #tpu.memory_space<vmem>>, vector<1x128xf32>
    %7 = vector.broadcast %6 : vector<1x128xf32> to vector<512x128xf32>
    %8 = arith.addf %5, %7 : vector<512x128xf32>
    %c0_7 = arith.constant 0 : index
    %c0_8 = arith.constant 0 : index
    %9 = vector.load %arg5[%c0_7, %c0_8] : memref<512x128xf32, #tpu.memory_space<vmem>>, vector<512x128xf32>
    tpu.vector_store %arg5[%c0_7, %c0_8], %8 {strides = array<i32>} : memref<512x128xf32, #tpu.memory_space<vmem>>, vector<512x128xf32>,
    return
  }
  func.func @transform_0(%arg0: i32) -> (i32, i32) {
    %c0_i32 = arith.constant 0 : i32
    %c0_i32_0 = arith.constant 0 : i32
    return %arg0, %c0_i32 : i32, i32
  }
  func.func @transform_1(%arg0: i32) -> (i32, i32) {
    %c0_i32 = arith.constant 0 : i32
    %c0_i32_0 = arith.constant 0 : i32
    %c0_i32_1 = arith.constant 0 : i32
    return %c0_i32, %c0_i32_0 : i32, i32
  }
  func.func @transform_2(%arg0: i32) -> (i32, i32) {
    %c0_i32 = arith.constant 0 : i32
    %c0_i32_0 = arith.constant 0 : i32
    %c0_i32_1 = arith.constant 0 : i32
    return %c0_i32, %c0_i32_0 : i32, i32
  }
  func.func @transform_3(%arg0: i32) -> (i32, i32) {
    %c0_i32 = arith.constant 0 : i32
    %c0_i32_0 = arith.constant 0 : i32
    %c0_i32_1 = arith.constant 0 : i32
    return %c0_i32, %c0_i32_0 : i32, i32
  }
  func.func @transform_4(%arg0: i32) -> (i32, i32) {
    %c0_i32 = arith.constant 0 : i32
    %c0_i32_0 = arith.constant 0 : i32
    return %arg0, %c0_i32 : i32, i32
  }
}

</mosaic_0001>

<bundles_post_ra>
// kernel: tpu_custom_call.1
= control target key start
LH: loop header
LB: loop body
LE: loop exit
PB: predicated region body
PF: predicated region fallthrough
CT: control target
= control target key end

     0   :  { %9 = vsyncpa [#allocation3], 0  ;;  %s1283_s0 = inlined_call_operand.hbm [shape: f32[512,128], index: 0, kind: input, shape index: {}]   ;;  %s1284_s1 = inlined_call_operand.hbm [shape: f32[128,128], index: 1, kind: input, shape index: {}]   ;;  %s1285_s2 = inlined_call_operand.vmem [shape: f32[1,128], index: 2, kind: input, shape index: {}]   ;;  %s1286_s3 = inlined_call_operand.vmem [shape: f32[1,128], index: 3, kind: input, shape index: {}]   ;;  %s1287_s4 = inlined_call_operand.hbm [shape: f32[512,128], index: 4, kind: output, shape index: {}]  }
   0x1   :  { %10 = vsyncpa [#allocation6], 0 }
   0x2   :  { %11 = vsyncpa [#allocation4], 0  ;;  %s1070_s15 = smov [#allocation2]   ;;  %s998_s19 = scalar_lea.hbm %s1283_s0, 8192 }
   0x3   :  { %s17_s16 = sshll.u32 %s1070_s15, 4  ;;  %p999_p0 = scmp.ne.s32.totalorder %s1283_s0, %s998_s19  ;;  %s18_s16 = int_to_ptr.vmem [resolvable:$true] %s17_s16 }
   0x4   :  { %p1002_p1 = scmp.lt.u32.totalorder %s998_s19, %s1283_s0 }
   0x6   :  { %p1004_p2 = pnand %p1002_p1, %p999_p0 }
   0x8   :  { %1007 = shalt.err (!%p1004_p2)
}
   0x9   :  { %s1008_s24 = scalar_lea.vmem %s18_s16, 8192  ;;  %p1013_p4 = scmp.lt.s32.totalorder %s18_s16, %s18_s16 }
   0xa   :  { %p1009_p3 = scmp.ne.s32.totalorder %s18_s16, %s1008_s24  ;;  %p1014_p5 = scmp.lt.s32.totalorder %s1008_s24, %s1008_s24 }
   0xc   :  { %p1015_p6 = por %p1014_p5, %p1013_p4 }
   0xe   :  { %p1016_p7 = pnand %p1015_p6, %p1009_p3 }
  0x10   :  { %1019 = shalt.err (!%p1016_p7)
}
  0x11   :  { %s1071_s25 = smov 128   ;;  %s1072_s26 = smov 8  }
  0x12   :  { %23 = dma.hbm_to_vmem [thread:$0]  %s1283_s0, 8192, %s18_s16, [#allocation3], %s1071_s25, %s1071_s25, %s1072_s26  }
  0x13   :  { %s1073_s29 = smov [#allocation5]   ;;  %s1020_s7 = scalar_lea.hbm %s1284_s1, 2048 }
  0x14   :  { %s29_s30 = sshll.u32 %s1073_s29, 4  ;;  %p1021_p8 = scmp.ne.s32.totalorder %s1284_s1, %s1020_s7  ;;  %s30_s30 = int_to_ptr.vmem [resolvable:$true] %s29_s30 }
  0x15   :  { %p1024_p9 = scmp.lt.u32.totalorder %s1020_s7, %s1284_s1 }
  0x17   :  { %p1026_p10 = pnand %p1024_p9, %p1021_p8 }
  0x19   :  { %1029 = shalt.err (!%p1026_p10)
}
  0x1a   :  { %s1030_s12 = scalar_lea.vmem %s30_s30, 2048  ;;  %p1035_p12 = scmp.lt.s32.totalorder %s30_s30, %s30_s30 }
  0x1b   :  { %p1031_p11 = scmp.ne.s32.totalorder %s30_s30, %s1030_s12  ;;  %p1036_p13 = scmp.lt.s32.totalorder %s1030_s12, %s1030_s12 }
  0x1d   :  { %p1037_p0 = por %p1036_p13, %p1035_p12 }
  0x1f   :  { %p1038_p1 = pnand %p1037_p0, %p1031_p11 }
  0x21   :  { %1041 = shalt.err (!%p1038_p1)
}
  0x22   :  { %35 = dma.hbm_to_vmem [thread:$0]  %s1284_s1, 2048, %s30_s30, [#allocation6], %s1071_s25, %s1071_s25, %s1072_s26  }
  0x23   :  { %1064 = dma.done.wait [#allocation3], 8192  }
  0x24   :  { %1065 = vsyncadd [#allocation3], 4294959104 }
  0x25   :  { %1066 = dma.done.wait [#allocation6], 2048  }
  0x26   :  { %1067 = vsyncadd [#allocation6], 4294965248  ;;  %v110_v0 = vld [vmem:[#allocation5] sm:$0xff]  ;;  %v111_v1 = vld [vmem:[#allocation5 + $0x8] sm:$0xff] }
  0x27   :  { %v112_v2 = vld [vmem:[#allocation5 + $0x10] sm:$0xff]  ;;  %v945_v3 = vpack.c.bf16 %v111_v1, %v110_v0  ;;  %v113_v4 = vld [vmem:[#allocation5 + $0x18] sm:$0xff]  ;;  %v114_v6 = vld [vmem:[#allocation5 + $0x20] sm:$0xff] }
  0x28   :  { %v949_v5 = vpack.c.bf16 %v113_v4, %v112_v2  ;;  %v115_v7 = vld [vmem:[#allocation5 + $0x28] sm:$0xff]  ;;  %v46_v9 = vld [vmem:[#allocation2] sm:$0xff]  ;;  %v116_v11 = vld [vmem:[#allocation5 + $0x30] sm:$0xff] }
  0x29   :  { %946 = vmatprep.subr.bf16.mxu0 %v945_v3  ;;  %977 = vmatprep.subr.bf16.mxu1 %v945_v3  ;;  %v953_v8 = vpack.c.bf16 %v115_v7, %v114_v6  ;;  %v78_v10 = vld [vmem:[#allocation2 + $0x100] sm:$0xff]  ;;  %v117_v12 = vld [vmem:[#allocation5 + $0x38] sm:$0xff]  ;;  %v119_v15 = vld [vmem:[#allocation5 + $0x48] sm:$0xff] }
  0x2a   :  { %948 = vmatpush3.bf16.msra.mxu0 %v945_v3  ;;  %985 = vmatpush3.bf16.msra.mxu1 %v945_v3  ;;  %v957_v13 = vpack.c.bf16 %v117_v12, %v116_v11  ;;  %v118_v14 = vld [vmem:[#allocation5 + $0x40] sm:$0xff]  ;;  %v120_v17 = vld [vmem:[#allocation5 + $0x50] sm:$0xff]  ;;  %v121_v18 = vld [vmem:[#allocation5 + $0x58] sm:$0xff] }
  0x2b   :  { %950 = vmatprep.subr.bf16.mxu0 %v949_v5  ;;  %978 = vmatprep.subr.bf16.mxu1 %v949_v5  ;;  %v961_v16 = vpack.c.bf16 %v119_v15, %v118_v14  ;;  %v965_v19 = vpack.c.bf16 %v121_v18, %v120_v17  ;;  %v122_v20 = vld [vmem:[#allocation5 + $0x60] sm:$0xff]  ;;  %v123_v21 = vld [vmem:[#allocation5 + $0x68] sm:$0xff]  ;;  %v124_v23 = vld [vmem:[#allocation5 + $0x70] sm:$0xff] }
  0x2c   :  { %849 = vmatprep.mubr.f32.mxu0 %v46_v9  ;;  %897 = vmatprep.mubr.f32.mxu1 %v78_v10  ;;  %v969_v22 = vpack.c.bf16 %v123_v21, %v122_v20  ;;  %v125_v24 = vld [vmem:[#allocation5 + $0x78] sm:$0xff]  ;;  %v47_v26 = vld [vmem:[#allocation2 + $0x8] sm:$0xff]  ;;  %v48_v28 = vld [vmem:[#allocation2 + $0x10] sm:$0xff] }
  0x2d   :  { %v973_v25 = vpack.c.bf16 %v125_v24, %v124_v23  ;;  %v79_v27 = vld [vmem:[#allocation2 + $0x108] sm:$0xff]  ;;  %v80_v29 = vld [vmem:[#allocation2 + $0x110] sm:$0xff]  ;;  %v49_v30 = vld [vmem:[#allocation2 + $0x18] sm:$0xff] }
  0x2e   :  { %952 = vmatpush3.bf16.msra.mxu0 %v949_v5  ;;  %986 = vmatpush3.bf16.msra.mxu1 %v949_v5  ;;  %v81_v31 = vld [vmem:[#allocation2 + $0x118] sm:$0xff]  ;;  %v50_v32 = vld [vmem:[#allocation2 + $0x20] sm:$0xff]  ;;  %v51_v34 = vld [vmem:[#allocation2 + $0x28] sm:$0xff] }
  0x2f   :  { %954 = vmatprep.subr.bf16.mxu0 %v953_v8  ;;  %979 = vmatprep.subr.bf16.mxu1 %v953_v8  ;;  %v82_v33 = vld [vmem:[#allocation2 + $0x120] sm:$0xff]  ;;  %v83_v35 = vld [vmem:[#allocation2 + $0x128] sm:$0xff]  ;;  %v52_v36 = vld [vmem:[#allocation2 + $0x30] sm:$0xff] }
  0x30   :  { %v84_v37 = vld [vmem:[#allocation2 + $0x130] sm:$0xff]  ;;  %v53_v38 = vld [vmem:[#allocation2 + $0x38] sm:$0xff]  ;;  %v54_v40 = vld [vmem:[#allocation2 + $0x40] sm:$0xff] }
  0x31   :  { %v85_v39 = vld [vmem:[#allocation2 + $0x138] sm:$0xff]  ;;  %v86_v41 = vld [vmem:[#allocation2 + $0x140] sm:$0xff]  ;;  %v55_v42 = vld [vmem:[#allocation2 + $0x48] sm:$0xff] }
  0x32   :  { %956 = vmatpush3.bf16.msra.mxu0 %v953_v8  ;;  %987 = vmatpush3.bf16.msra.mxu1 %v953_v8  ;;  %v87_v43 = vld [vmem:[#allocation2 + $0x148] sm:$0xff]  ;;  %v56_v44 = vld [vmem:[#allocation2 + $0x50] sm:$0xff]  ;;  %v57_v46 = vld [vmem:[#allocation2 + $0x58] sm:$0xff] }
  0x33   :  { %958 = vmatprep.subr.bf16.mxu0 %v957_v13  ;;  %980 = vmatprep.subr.bf16.mxu1 %v957_v13  ;;  %v88_v45 = vld [vmem:[#allocation2 + $0x150] sm:$0xff]  ;;  %v89_v47 = vld [vmem:[#allocation2 + $0x158] sm:$0xff]  ;;  %v58_v48 = vld [vmem:[#allocation2 + $0x60] sm:$0xff] }
  0x34   :  { %v90_v49 = vld [vmem:[#allocation2 + $0x160] sm:$0xff]  ;;  %v59_v50 = vld [vmem:[#allocation2 + $0x68] sm:$0xff]  ;;  %v60_v52 = vld [vmem:[#allocation2 + $0x70] sm:$0xff] }
  0x35   :  { %v91_v51 = vld [vmem:[#allocation2 + $0x168] sm:$0xff]  ;;  %v92_v53 = vld [vmem:[#allocation2 + $0x170] sm:$0xff]  ;;  %v61_v54 = vld [vmem:[#allocation2 + $0x78] sm:$0xff] }
  0x36   :  { %960 = vmatpush3.bf16.msra.mxu0 %v957_v13  ;;  %988 = vmatpush3.bf16.msra.mxu1 %v957_v13  ;;  %v93_v55 = vld [vmem:[#allocation2 + $0x178] sm:$0xff]  ;;  %v62_v56 = vld [vmem:[#allocation2 + $0x80] sm:$0xff]  ;;  %v63_v58 = vld [vmem:[#allocation2 + $0x88] sm:$0xff] }
  0x37   :  { %962 = vmatprep.subr.bf16.mxu0 %v961_v16  ;;  %981 = vmatprep.subr.bf16.mxu1 %v961_v16  ;;  %v94_v57 = vld [vmem:[#allocation2 + $0x180] sm:$0xff]  ;;  %v95_v59 = vld [vmem:[#allocation2 + $0x188] sm:$0xff]  ;;  %v64_v60 = vld [vmem:[#allocation2 + $0x90] sm:$0xff] }
  0x38   :  { %v96_v61 = vld [vmem:[#allocation2 + $0x190] sm:$0xff]  ;;  %v65_v62 = vld [vmem:[#allocation2 + $0x98] sm:$0xff]  ;;  %v66_v0 = vld [vmem:[#allocation2 + $0xa0] sm:$0xff] }
  0x39   :  { %v97_v63 = vld [vmem:[#allocation2 + $0x198] sm:$0xff]  ;;  %v98_v1 = vld [vmem:[#allocation2 + $0x1a0] sm:$0xff]  ;;  %v67_v2 = vld [vmem:[#allocation2 + $0xa8] sm:$0xff] }
  0x3a   :  { %964 = vmatpush3.bf16.msra.mxu0 %v961_v16  ;;  %989 = vmatpush3.bf16.msra.mxu1 %v961_v16  ;;  %v99_v3 = vld [vmem:[#allocation2 + $0x1a8] sm:$0xff]  ;;  %v68_v4 = vld [vmem:[#allocation2 + $0xb0] sm:$0xff]  ;;  %v69_v6 = vld [vmem:[#allocation2 + $0xb8] sm:$0xff] }
  0x3b   :  { %966 = vmatprep.subr.bf16.mxu0 %v965_v19  ;;  %982 = vmatprep.subr.bf16.mxu1 %v965_v19  ;;  %v100_v5 = vld [vmem:[#allocation2 + $0x1b0] sm:$0xff]  ;;  %v101_v7 = vld [vmem:[#allocation2 + $0x1b8] sm:$0xff]  ;;  %v70_v8 = vld [vmem:[#allocation2 + $0xc0] sm:$0xff] }
  0x3c   :  { %v102_v9 = vld [vmem:[#allocation2 + $0x1c0] sm:$0xff]  ;;  %v71_v10 = vld [vmem:[#allocation2 + $0xc8] sm:$0xff]  ;;  %v72_v12 = vld [vmem:[#allocation2 + $0xd0] sm:$0xff] }
  0x3d   :  { %v103_v11 = vld [vmem:[#allocation2 + $0x1c8] sm:$0xff]  ;;  %v104_v13 = vld [vmem:[#allocation2 + $0x1d0] sm:$0xff]  ;;  %v73_v14 = vld [vmem:[#allocation2 + $0xd8] sm:$0xff] }
  0x3e   :  { %968 = vmatpush3.bf16.msra.mxu0 %v965_v19  ;;  %990 = vmatpush3.bf16.msra.mxu1 %v965_v19  ;;  %v105_v15 = vld [vmem:[#allocation2 + $0x1d8] sm:$0xff]  ;;  %v74_v16 = vld [vmem:[#allocation2 + $0xe0] sm:$0xff]  ;;  %v75_v18 = vld [vmem:[#allocation2 + $0xe8] sm:$0xff] }
  0x3f   :  { %970 = vmatprep.subr.bf16.mxu0 %v969_v22  ;;  %983 = vmatprep.subr.bf16.mxu1 %v969_v22  ;;  %v106_v17 = vld [vmem:[#allocation2 + $0x1e0] sm:$0xff]  ;;  %v107_v19 = vld [vmem:[#allocation2 + $0x1e8] sm:$0xff]  ;;  %v76_v20 = vld [vmem:[#allocation2 + $0xf0] sm:$0xff] }
  0x40   :  { %v108_v21 = vld [vmem:[#allocation2 + $0x1f0] sm:$0xff]  ;;  %v109_v23 = vld [vmem:[#allocation2 + $0x1f8] sm:$0xff]  ;;  %v1133_v24 = vld [vmem:[%s1285_s2] ss:$0 sm:$0xff]  ;;  %s1074_s2 = smov [#allocation7]  }
  0x42   :  { %972 = vmatpush3.bf16.msra.mxu0 %v969_v22  ;;  %991 = vmatpush3.bf16.msra.mxu1 %v969_v22  ;;  %v77_v22 = vld [vmem:[#allocation2 + $0xf8] sm:$0xff] }
  0x43   :  { %974 = vmatprep.subr.bf16.mxu0 %v973_v25  ;;  %984 = vmatprep.subr.bf16.mxu1 %v973_v25 }
  0x46   :  { %976 = vmatpush3.bf16.msra.mxu0 %v973_v25  ;;  %992 = vmatpush3.bf16.msra.mxu1 %v973_v25 }
  0x49   :  { %850 = vmatmul.mubr.f32.vlgmr.msra.gmra.mrb[0].mxu0 %v47_v26  ;;  %898 = vmatmul.mubr.f32.vlgmr.msra.gmra.mrb[0].mxu1 %v79_v27  ;;  %v1138_v26 = vld [vmem:[%s1286_s3] ss:$0 sm:$0xff]  ;;  %s722_s3 = sshll.u32 %s1074_s2, 4  ;;  %s723_s3 = int_to_ptr.vmem [resolvable:$true] %s722_s3 }
  0x4a   :  { %852 = vmatprep.mubr.f32.mxu0 %v48_v28  ;;  %900 = vmatprep.mubr.f32.mxu1 %v80_v29  ;;  %s1042_s17 = scalar_lea.vmem %s723_s3, 8192  ;;  %p1047_p3 = scmp.lt.s32.totalorder %s723_s3, %s723_s3 }
  0x4b   :  { %p1043_p2 = scmp.ne.s32.totalorder %s723_s3, %s1042_s17  ;;  %p1048_p4 = scmp.lt.s32.totalorder %s1042_s17, %s1042_s17 }
  0x4d   :  { %853 = vmatmul.mubr.f32.gmra.mrb[2].mxu0 %v49_v30  ;;  %901 = vmatmul.mubr.f32.gmra.mrb[2].mxu1 %v81_v31  ;;  %p1049_p5 = por %p1048_p4, %p1047_p3 }
  0x4e   :  { %855 = vmatprep.mubr.f32.mxu0 %v50_v32  ;;  %903 = vmatprep.mubr.f32.mxu1 %v82_v33 }
  0x4f   :  { %p1050_p6 = pnand %p1049_p5, %p1043_p2 }
  0x51   :  { %856 = vmatmul.mubr.f32.gmra.mrb[4].mxu0 %v51_v34  ;;  %904 = vmatmul.mubr.f32.gmra.mrb[4].mxu1 %v83_v35 }
  0x52   :  { %858 = vmatprep.mubr.f32.mxu0 %v52_v36  ;;  %906 = vmatprep.mubr.f32.mxu1 %v84_v37 }
  0x55   :  { %859 = vmatmul.mubr.f32.gmra.mrb[6].mxu0 %v53_v38  ;;  %907 = vmatmul.mubr.f32.gmra.mrb[6].mxu1 %v85_v39 }
  0x56   :  { %861 = vmatprep.mubr.f32.mxu0 %v54_v40  ;;  %909 = vmatprep.mubr.f32.mxu1 %v86_v41 }
  0x59   :  { %862 = vmatmul.mubr.f32.gmra.mrb[8].mxu0 %v55_v42  ;;  %910 = vmatmul.mubr.f32.gmra.mrb[8].mxu1 %v87_v43 }
  0x5a   :  { %864 = vmatprep.mubr.f32.mxu0 %v56_v44  ;;  %912 = vmatprep.mubr.f32.mxu1 %v88_v45 }
  0x5d   :  { %865 = vmatmul.mubr.f32.gmra.mrb[10].mxu0 %v57_v46  ;;  %913 = vmatmul.mubr.f32.gmra.mrb[10].mxu1 %v89_v47 }
  0x5e   :  { %867 = vmatprep.mubr.f32.mxu0 %v58_v48  ;;  %915 = vmatprep.mubr.f32.mxu1 %v90_v49 }
  0x61   :  { %868 = vmatmul.mubr.f32.gmra.mrb[12].mxu0 %v59_v50  ;;  %916 = vmatmul.mubr.f32.gmra.mrb[12].mxu1 %v91_v51 }
  0x62   :  { %870 = vmatprep.mubr.f32.mxu0 %v60_v52  ;;  %918 = vmatprep.mubr.f32.mxu1 %v92_v53 }
  0x65   :  { %871 = vmatmul.mubr.f32.gmra.mrb[14].mxu0 %v61_v54  ;;  %919 = vmatmul.mubr.f32.gmra.mrb[14].mxu1 %v93_v55 }
  0x66   :  { %873 = vmatprep.mubr.f32.mxu0 %v62_v56  ;;  %921 = vmatprep.mubr.f32.mxu1 %v94_v57 }
  0x69   :  { %874 = vmatmul.mubr.f32.gmra.mrb[16].mxu0 %v63_v58  ;;  %922 = vmatmul.mubr.f32.gmra.mrb[16].mxu1 %v95_v59 }
  0x6a   :  { %876 = vmatprep.mubr.f32.mxu0 %v64_v60  ;;  %924 = vmatprep.mubr.f32.mxu1 %v96_v61 }
  0x6d   :  { %877 = vmatmul.mubr.f32.gmra.mrb[18].mxu0 %v65_v62  ;;  %925 = vmatmul.mubr.f32.gmra.mrb[18].mxu1 %v97_v63 }
  0x6e   :  { %879 = vmatprep.mubr.f32.mxu0 %v66_v0  ;;  %927 = vmatprep.mubr.f32.mxu1 %v98_v1 }
  0x71   :  { %880 = vmatmul.mubr.f32.gmra.mrb[20].mxu0 %v67_v2  ;;  %928 = vmatmul.mubr.f32.gmra.mrb[20].mxu1 %v99_v3 }
  0x72   :  { %882 = vmatprep.mubr.f32.mxu0 %v68_v4  ;;  %930 = vmatprep.mubr.f32.mxu1 %v100_v5 }
  0x75   :  { %883 = vmatmul.mubr.f32.gmra.mrb[22].mxu0 %v69_v6  ;;  %931 = vmatmul.mubr.f32.gmra.mrb[22].mxu1 %v101_v7 }
  0x76   :  { %885 = vmatprep.mubr.f32.mxu0 %v70_v8  ;;  %933 = vmatprep.mubr.f32.mxu1 %v102_v9 }
  0x79   :  { %886 = vmatmul.mubr.f32.gmra.mrb[24].mxu0 %v71_v10  ;;  %934 = vmatmul.mubr.f32.gmra.mrb[24].mxu1 %v103_v11 }
  0x7a   :  { %888 = vmatprep.mubr.f32.mxu0 %v72_v12  ;;  %936 = vmatprep.mubr.f32.mxu1 %v104_v13 }
  0x7d   :  { %889 = vmatmul.mubr.f32.gmra.mrb[26].mxu0 %v73_v14  ;;  %937 = vmatmul.mubr.f32.gmra.mrb[26].mxu1 %v105_v15 }
  0x7e   :  { %891 = vmatprep.mubr.f32.mxu0 %v74_v16  ;;  %939 = vmatprep.mubr.f32.mxu1 %v106_v17 }
  0x81   :  { %892 = vmatmul.mubr.f32.gmra.mrb[28].mxu0 %v75_v18  ;;  %940 = vmatmul.mubr.f32.gmra.mrb[28].mxu1 %v107_v19 }
  0x82   :  { %894 = vmatprep.mubr.f32.mxu0 %v76_v20  ;;  %942 = vmatprep.mubr.f32.mxu1 %v108_v21 }
  0x85   :  { %895 = vmatmul.mubr.f32.gmra.mrb[30].mxu0 %v77_v22  ;;  %943 = vmatmul.mubr.f32.gmra.mrb[30].mxu1 %v109_v23 }
 0x11c   :  { %v851_v25 = vpop.f32.mrb[0].mxu0  ;;  %v899_v27 = vpop.f32.mrb[0].mxu1 }
 0x11d   :  { %v519_v28 = vmul.f32 %v851_v25, %v1133_v24  ;;  %v551_v29 = vmul.f32 %v899_v27, %v1133_v24  ;;  %v192_v30 = vpop.f32.mrb[1].mxu0  ;;  %v352_v31 = vpop.f32.mrb[1].mxu1 }
 0x11e   :  { %v518_v32 = vmul.f32 %v1133_v24, %v192_v30  ;;  %v550_v33 = vmul.f32 %v1133_v24, %v352_v31 }
 0x11f   :  { %v590_v34 = vadd.f32 %v1138_v26, %v519_v28  ;;  %v622_v35 = vadd.f32 %v1138_v26, %v551_v29 }
 0x120   :  { %v589_v36 = vadd.f32 %v1138_v26, %v518_v32  ;;  %v621_v37 = vadd.f32 %v1138_v26, %v550_v33  ;;  %v854_v38 = vpop.f32.mrb[2].mxu0  ;;  %v902_v39 = vpop.f32.mrb[2].mxu1 }
 0x121   :  { %654 = vst [vmem:[#allocation7 + $0x8] sm:$0xff] %v590_v34  ;;  %686 = vst [vmem:[#allocation7 + $0x108] sm:$0xff] %v622_v35  ;;  %v521_v40 = vmul.f32 %v854_v38, %v1133_v24  ;;  %v553_v41 = vmul.f32 %v902_v39, %v1133_v24  ;;  %v202_v42 = vpop.f32.mrb[3].mxu0  ;;  %v362_v43 = vpop.f32.mrb[3].mxu1 }
 0x122   :  { %653 = vst [vmem:[#allocation7] sm:$0xff] %v589_v36  ;;  %685 = vst [vmem:[#allocation7 + $0x100] sm:$0xff] %v621_v37  ;;  %v520_v44 = vmul.f32 %v1133_v24, %v202_v42  ;;  %v552_v45 = vmul.f32 %v1133_v24, %v362_v43 }
 0x123   :  { %v592_v46 = vadd.f32 %v1138_v26, %v521_v40  ;;  %v624_v47 = vadd.f32 %v1138_v26, %v553_v41 }
 0x124   :  { %v591_v48 = vadd.f32 %v1138_v26, %v520_v44  ;;  %v623_v49 = vadd.f32 %v1138_v26, %v552_v45  ;;  %v857_v50 = vpop.f32.mrb[4].mxu0  ;;  %v905_v51 = vpop.f32.mrb[4].mxu1 }
 0x125   :  { %656 = vst [vmem:[#allocation7 + $0x18] sm:$0xff] %v592_v46  ;;  %688 = vst [vmem:[#allocation7 + $0x118] sm:$0xff] %v624_v47  ;;  %v523_v52 = vmul.f32 %v857_v50, %v1133_v24  ;;  %v555_v53 = vmul.f32 %v905_v51, %v1133_v24  ;;  %v212_v54 = vpop.f32.mrb[5].mxu0  ;;  %v372_v55 = vpop.f32.mrb[5].mxu1 }
 0x126   :  { %655 = vst [vmem:[#allocation7 + $0x10] sm:$0xff] %v591_v48  ;;  %687 = vst [vmem:[#allocation7 + $0x110] sm:$0xff] %v623_v49  ;;  %v522_v56 = vmul.f32 %v1133_v24, %v212_v54  ;;  %v554_v57 = vmul.f32 %v1133_v24, %v372_v55 }
 0x127   :  { %v594_v58 = vadd.f32 %v1138_v26, %v523_v52  ;;  %v626_v59 = vadd.f32 %v1138_v26, %v555_v53 }
 0x128   :  { %v593_v60 = vadd.f32 %v1138_v26, %v522_v56  ;;  %v625_v61 = vadd.f32 %v1138_v26, %v554_v57  ;;  %v860_v62 = vpop.f32.mrb[6].mxu0  ;;  %v908_v63 = vpop.f32.mrb[6].mxu1 }
 0x129   :  { %658 = vst [vmem:[#allocation7 + $0x28] sm:$0xff] %v594_v58  ;;  %690 = vst [vmem:[#allocation7 + $0x128] sm:$0xff] %v626_v59  ;;  %v525_v0 = vmul.f32 %v860_v62, %v1133_v24  ;;  %v557_v1 = vmul.f32 %v908_v63, %v1133_v24  ;;  %v222_v2 = vpop.f32.mrb[7].mxu0  ;;  %v382_v3 = vpop.f32.mrb[7].mxu1 }
 0x12a   :  { %657 = vst [vmem:[#allocation7 + $0x20] sm:$0xff] %v593_v60  ;;  %689 = vst [vmem:[#allocation7 + $0x120] sm:$0xff] %v625_v61  ;;  %v524_v4 = vmul.f32 %v1133_v24, %v222_v2  ;;  %v556_v5 = vmul.f32 %v1133_v24, %v382_v3 }
 0x12b   :  { %v596_v6 = vadd.f32 %v1138_v26, %v525_v0  ;;  %v628_v7 = vadd.f32 %v1138_v26, %v557_v1 }
 0x12c   :  { %v595_v8 = vadd.f32 %v1138_v26, %v524_v4  ;;  %v627_v9 = vadd.f32 %v1138_v26, %v556_v5  ;;  %v863_v10 = vpop.f32.mrb[8].mxu0  ;;  %v911_v11 = vpop.f32.mrb[8].mxu1 }
 0x12d   :  { %660 = vst [vmem:[#allocation7 + $0x38] sm:$0xff] %v596_v6  ;;  %692 = vst [vmem:[#allocation7 + $0x138] sm:$0xff] %v628_v7  ;;  %v527_v12 = vmul.f32 %v863_v10, %v1133_v24  ;;  %v559_v13 = vmul.f32 %v911_v11, %v1133_v24  ;;  %v232_v14 = vpop.f32.mrb[9].mxu0  ;;  %v392_v15 = vpop.f32.mrb[9].mxu1 }
 0x12e   :  { %659 = vst [vmem:[#allocation7 + $0x30] sm:$0xff] %v595_v8  ;;  %691 = vst [vmem:[#allocation7 + $0x130] sm:$0xff] %v627_v9  ;;  %v526_v16 = vmul.f32 %v1133_v24, %v232_v14  ;;  %v558_v17 = vmul.f32 %v1133_v24, %v392_v15 }
 0x12f   :  { %v598_v18 = vadd.f32 %v1138_v26, %v527_v12  ;;  %v630_v19 = vadd.f32 %v1138_v26, %v559_v13 }
 0x130   :  { %v597_v20 = vadd.f32 %v1138_v26, %v526_v16  ;;  %v629_v21 = vadd.f32 %v1138_v26, %v558_v17  ;;  %v866_v22 = vpop.f32.mrb[10].mxu0  ;;  %v914_v23 = vpop.f32.mrb[10].mxu1 }
 0x131   :  { %662 = vst [vmem:[#allocation7 + $0x48] sm:$0xff] %v598_v18  ;;  %694 = vst [vmem:[#allocation7 + $0x148] sm:$0xff] %v630_v19  ;;  %v529_v25 = vmul.f32 %v866_v22, %v1133_v24  ;;  %v561_v27 = vmul.f32 %v914_v23, %v1133_v24  ;;  %v242_v28 = vpop.f32.mrb[11].mxu0  ;;  %v402_v29 = vpop.f32.mrb[11].mxu1 }
 0x132   :  { %661 = vst [vmem:[#allocation7 + $0x40] sm:$0xff] %v597_v20  ;;  %693 = vst [vmem:[#allocation7 + $0x140] sm:$0xff] %v629_v21  ;;  %v528_v30 = vmul.f32 %v1133_v24, %v242_v28  ;;  %v560_v31 = vmul.f32 %v1133_v24, %v402_v29 }
 0x133   :  { %v600_v32 = vadd.f32 %v1138_v26, %v529_v25  ;;  %v632_v33 = vadd.f32 %v1138_v26, %v561_v27 }
 0x134   :  { %v599_v34 = vadd.f32 %v1138_v26, %v528_v30  ;;  %v631_v35 = vadd.f32 %v1138_v26, %v560_v31  ;;  %v869_v36 = vpop.f32.mrb[12].mxu0  ;;  %v917_v37 = vpop.f32.mrb[12].mxu1 }
 0x135   :  { %664 = vst [vmem:[#allocation7 + $0x58] sm:$0xff] %v600_v32  ;;  %696 = vst [vmem:[#allocation7 + $0x158] sm:$0xff] %v632_v33  ;;  %v531_v38 = vmul.f32 %v869_v36, %v1133_v24  ;;  %v563_v39 = vmul.f32 %v917_v37, %v1133_v24  ;;  %v252_v40 = vpop.f32.mrb[13].mxu0  ;;  %v412_v41 = vpop.f32.mrb[13].mxu1 }
 0x136   :  { %663 = vst [vmem:[#allocation7 + $0x50] sm:$0xff] %v599_v34  ;;  %695 = vst [vmem:[#allocation7 + $0x150] sm:$0xff] %v631_v35  ;;  %v530_v42 = vmul.f32 %v1133_v24, %v252_v40  ;;  %v562_v43 = vmul.f32 %v1133_v24, %v412_v41 }
 0x137   :  { %v602_v44 = vadd.f32 %v1138_v26, %v531_v38  ;;  %v634_v45 = vadd.f32 %v1138_v26, %v563_v39 }
 0x138   :  { %v601_v46 = vadd.f32 %v1138_v26, %v530_v42  ;;  %v633_v47 = vadd.f32 %v1138_v26, %v562_v43  ;;  %v872_v48 = vpop.f32.mrb[14].mxu0  ;;  %v920_v49 = vpop.f32.mrb[14].mxu1 }
 0x139   :  { %666 = vst [vmem:[#allocation7 + $0x68] sm:$0xff] %v602_v44  ;;  %698 = vst [vmem:[#allocation7 + $0x168] sm:$0xff] %v634_v45  ;;  %v533_v50 = vmul.f32 %v872_v48, %v1133_v24  ;;  %v565_v51 = vmul.f32 %v920_v49, %v1133_v24  ;;  %v262_v52 = vpop.f32.mrb[15].mxu0  ;;  %v422_v53 = vpop.f32.mrb[15].mxu1 }
 0x13a   :  { %665 = vst [vmem:[#allocation7 + $0x60] sm:$0xff] %v601_v46  ;;  %697 = vst [vmem:[#allocation7 + $0x160] sm:$0xff] %v633_v47  ;;  %v532_v54 = vmul.f32 %v1133_v24, %v262_v52  ;;  %v564_v55 = vmul.f32 %v1133_v24, %v422_v53 }
 0x13b   :  { %v604_v56 = vadd.f32 %v1138_v26, %v533_v50  ;;  %v636_v57 = vadd.f32 %v1138_v26, %v565_v51 }
 0x13c   :  { %v603_v58 = vadd.f32 %v1138_v26, %v532_v54  ;;  %v635_v59 = vadd.f32 %v1138_v26, %v564_v55  ;;  %v875_v60 = vpop.f32.mrb[16].mxu0  ;;  %v923_v61 = vpop.f32.mrb[16].mxu1 }
 0x13d   :  { %668 = vst [vmem:[#allocation7 + $0x78] sm:$0xff] %v604_v56  ;;  %700 = vst [vmem:[#allocation7 + $0x178] sm:$0xff] %v636_v57  ;;  %v535_v62 = vmul.f32 %v875_v60, %v1133_v24  ;;  %v567_v63 = vmul.f32 %v923_v61, %v1133_v24  ;;  %v272_v0 = vpop.f32.mrb[17].mxu0  ;;  %v432_v1 = vpop.f32.mrb[17].mxu1 }
 0x13e   :  { %667 = vst [vmem:[#allocation7 + $0x70] sm:$0xff] %v603_v58  ;;  %699 = vst [vmem:[#allocation7 + $0x170] sm:$0xff] %v635_v59  ;;  %v534_v2 = vmul.f32 %v1133_v24, %v272_v0  ;;  %v566_v3 = vmul.f32 %v1133_v24, %v432_v1 }
 0x13f   :  { %v606_v4 = vadd.f32 %v1138_v26, %v535_v62  ;;  %v638_v5 = vadd.f32 %v1138_v26, %v567_v63 }
 0x140   :  { %v605_v6 = vadd.f32 %v1138_v26, %v534_v2  ;;  %v637_v7 = vadd.f32 %v1138_v26, %v566_v3  ;;  %v878_v8 = vpop.f32.mrb[18].mxu0  ;;  %v926_v9 = vpop.f32.mrb[18].mxu1 }
 0x141   :  { %670 = vst [vmem:[#allocation7 + $0x88] sm:$0xff] %v606_v4  ;;  %702 = vst [vmem:[#allocation7 + $0x188] sm:$0xff] %v638_v5  ;;  %v537_v10 = vmul.f32 %v878_v8, %v1133_v24  ;;  %v569_v11 = vmul.f32 %v926_v9, %v1133_v24  ;;  %v282_v12 = vpop.f32.mrb[19].mxu0  ;;  %v442_v13 = vpop.f32.mrb[19].mxu1 }
 0x142   :  { %669 = vst [vmem:[#allocation7 + $0x80] sm:$0xff] %v605_v6  ;;  %701 = vst [vmem:[#allocation7 + $0x180] sm:$0xff] %v637_v7  ;;  %v536_v14 = vmul.f32 %v1133_v24, %v282_v12  ;;  %v568_v15 = vmul.f32 %v1133_v24, %v442_v13 }
 0x143   :  { %v608_v16 = vadd.f32 %v1138_v26, %v537_v10  ;;  %v640_v17 = vadd.f32 %v1138_v26, %v569_v11 }
 0x144   :  { %v607_v18 = vadd.f32 %v1138_v26, %v536_v14  ;;  %v639_v19 = vadd.f32 %v1138_v26, %v568_v15  ;;  %v881_v20 = vpop.f32.mrb[20].mxu0  ;;  %v929_v21 = vpop.f32.mrb[20].mxu1 }
 0x145   :  { %672 = vst [vmem:[#allocation7 + $0x98] sm:$0xff] %v608_v16  ;;  %704 = vst [vmem:[#allocation7 + $0x198] sm:$0xff] %v640_v17  ;;  %v539_v22 = vmul.f32 %v881_v20, %v1133_v24  ;;  %v571_v23 = vmul.f32 %v929_v21, %v1133_v24  ;;  %v292_v25 = vpop.f32.mrb[21].mxu0  ;;  %v452_v27 = vpop.f32.mrb[21].mxu1 }
 0x146   :  { %671 = vst [vmem:[#allocation7 + $0x90] sm:$0xff] %v607_v18  ;;  %703 = vst [vmem:[#allocation7 + $0x190] sm:$0xff] %v639_v19  ;;  %v538_v28 = vmul.f32 %v1133_v24, %v292_v25  ;;  %v570_v29 = vmul.f32 %v1133_v24, %v452_v27 }
 0x147   :  { %v610_v30 = vadd.f32 %v1138_v26, %v539_v22  ;;  %v642_v31 = vadd.f32 %v1138_v26, %v571_v23 }
 0x148   :  { %v609_v32 = vadd.f32 %v1138_v26, %v538_v28  ;;  %v641_v33 = vadd.f32 %v1138_v26, %v570_v29  ;;  %v884_v34 = vpop.f32.mrb[22].mxu0  ;;  %v932_v35 = vpop.f32.mrb[22].mxu1 }
 0x149   :  { %674 = vst [vmem:[#allocation7 + $0xa8] sm:$0xff] %v610_v30  ;;  %706 = vst [vmem:[#allocation7 + $0x1a8] sm:$0xff] %v642_v31  ;;  %v541_v36 = vmul.f32 %v884_v34, %v1133_v24  ;;  %v573_v37 = vmul.f32 %v932_v35, %v1133_v24  ;;  %v302_v38 = vpop.f32.mrb[23].mxu0  ;;  %v462_v39 = vpop.f32.mrb[23].mxu1 }
 0x14a   :  { %673 = vst [vmem:[#allocation7 + $0xa0] sm:$0xff] %v609_v32  ;;  %705 = vst [vmem:[#allocation7 + $0x1a0] sm:$0xff] %v641_v33  ;;  %v540_v40 = vmul.f32 %v1133_v24, %v302_v38  ;;  %v572_v41 = vmul.f32 %v1133_v24, %v462_v39 }
 0x14b   :  { %v612_v42 = vadd.f32 %v1138_v26, %v541_v36  ;;  %v644_v43 = vadd.f32 %v1138_v26, %v573_v37 }
 0x14c   :  { %v611_v44 = vadd.f32 %v1138_v26, %v540_v40  ;;  %v643_v45 = vadd.f32 %v1138_v26, %v572_v41  ;;  %v887_v46 = vpop.f32.mrb[24].mxu0  ;;  %v935_v47 = vpop.f32.mrb[24].mxu1 }
 0x14d   :  { %676 = vst [vmem:[#allocation7 + $0xb8] sm:$0xff] %v612_v42  ;;  %708 = vst [vmem:[#allocation7 + $0x1b8] sm:$0xff] %v644_v43  ;;  %v543_v48 = vmul.f32 %v887_v46, %v1133_v24  ;;  %v575_v49 = vmul.f32 %v935_v47, %v1133_v24  ;;  %v312_v50 = vpop.f32.mrb[25].mxu0  ;;  %v472_v51 = vpop.f32.mrb[25].mxu1 }
 0x14e   :  { %675 = vst [vmem:[#allocation7 + $0xb0] sm:$0xff] %v611_v44  ;;  %707 = vst [vmem:[#allocation7 + $0x1b0] sm:$0xff] %v643_v45  ;;  %v542_v52 = vmul.f32 %v1133_v24, %v312_v50  ;;  %v574_v53 = vmul.f32 %v1133_v24, %v472_v51 }
 0x14f   :  { %v614_v54 = vadd.f32 %v1138_v26, %v543_v48  ;;  %v646_v55 = vadd.f32 %v1138_v26, %v575_v49 }
 0x150   :  { %v613_v56 = vadd.f32 %v1138_v26, %v542_v52  ;;  %v645_v57 = vadd.f32 %v1138_v26, %v574_v53  ;;  %v890_v58 = vpop.f32.mrb[26].mxu0  ;;  %v938_v59 = vpop.f32.mrb[26].mxu1 }
 0x151   :  { %678 = vst [vmem:[#allocation7 + $0xc8] sm:$0xff] %v614_v54  ;;  %710 = vst [vmem:[#allocation7 + $0x1c8] sm:$0xff] %v646_v55  ;;  %v545_v60 = vmul.f32 %v890_v58, %v1133_v24  ;;  %v577_v61 = vmul.f32 %v938_v59, %v1133_v24  ;;  %v322_v62 = vpop.f32.mrb[27].mxu0  ;;  %v482_v63 = vpop.f32.mrb[27].mxu1 }
 0x152   :  { %677 = vst [vmem:[#allocation7 + $0xc0] sm:$0xff] %v613_v56  ;;  %709 = vst [vmem:[#allocation7 + $0x1c0] sm:$0xff] %v645_v57  ;;  %v544_v0 = vmul.f32 %v1133_v24, %v322_v62  ;;  %v576_v1 = vmul.f32 %v1133_v24, %v482_v63 }
 0x153   :  { %v616_v2 = vadd.f32 %v1138_v26, %v545_v60  ;;  %v648_v3 = vadd.f32 %v1138_v26, %v577_v61 }
 0x154   :  { %v615_v4 = vadd.f32 %v1138_v26, %v544_v0  ;;  %v647_v5 = vadd.f32 %v1138_v26, %v576_v1  ;;  %v893_v6 = vpop.f32.mrb[28].mxu0  ;;  %v941_v7 = vpop.f32.mrb[28].mxu1 }
 0x155   :  { %680 = vst [vmem:[#allocation7 + $0xd8] sm:$0xff] %v616_v2  ;;  %712 = vst [vmem:[#allocation7 + $0x1d8] sm:$0xff] %v648_v3  ;;  %v547_v8 = vmul.f32 %v893_v6, %v1133_v24  ;;  %v579_v9 = vmul.f32 %v941_v7, %v1133_v24  ;;  %v332_v10 = vpop.f32.mrb[29].mxu0  ;;  %v492_v11 = vpop.f32.mrb[29].mxu1 }
 0x156   :  { %679 = vst [vmem:[#allocation7 + $0xd0] sm:$0xff] %v615_v4  ;;  %711 = vst [vmem:[#allocation7 + $0x1d0] sm:$0xff] %v647_v5  ;;  %v546_v12 = vmul.f32 %v1133_v24, %v332_v10  ;;  %v578_v13 = vmul.f32 %v1133_v24, %v492_v11 }
 0x157   :  { %v618_v14 = vadd.f32 %v1138_v26, %v547_v8  ;;  %v650_v15 = vadd.f32 %v1138_v26, %v579_v9 }
 0x158   :  { %v617_v16 = vadd.f32 %v1138_v26, %v546_v12  ;;  %v649_v17 = vadd.f32 %v1138_v26, %v578_v13  ;;  %v896_v18 = vpop.f32.mrb[30].mxu0  ;;  %v944_v19 = vpop.f32.mrb[30].mxu1 }
 0x159   :  { %682 = vst [vmem:[#allocation7 + $0xe8] sm:$0xff] %v618_v14  ;;  %714 = vst [vmem:[#allocation7 + $0x1e8] sm:$0xff] %v650_v15  ;;  %v549_v20 = vmul.f32 %v896_v18, %v1133_v24  ;;  %v581_v21 = vmul.f32 %v944_v19, %v1133_v24  ;;  %v342_v22 = vpop.f32.mrb[31].mxu0  ;;  %v502_v23 = vpop.f32.mrb[31].mxu1 }
 0x15a   :  { %681 = vst [vmem:[#allocation7 + $0xe0] sm:$0xff] %v617_v16  ;;  %713 = vst [vmem:[#allocation7 + $0x1e0] sm:$0xff] %v649_v17  ;;  %v548_v25 = vmul.f32 %v1133_v24, %v342_v22  ;;  %v580_v27 = vmul.f32 %v1133_v24, %v502_v23 }
 0x15b   :  { %v620_v28 = vadd.f32 %v1138_v26, %v549_v20  ;;  %v652_v29 = vadd.f32 %v1138_v26, %v581_v21 }
 0x15c   :  { %v619_v30 = vadd.f32 %v1138_v26, %v548_v25  ;;  %v651_v31 = vadd.f32 %v1138_v26, %v580_v27 }
 0x15d   :  { %684 = vst [vmem:[#allocation7 + $0xf8] sm:$0xff] %v620_v28  ;;  %716 = vst [vmem:[#allocation7 + $0x1f8] sm:$0xff] %v652_v29 }
 0x15e   :  { %683 = vst [vmem:[#allocation7 + $0xf0] sm:$0xff] %v619_v30  ;;  %715 = vst [vmem:[#allocation7 + $0x1f0] sm:$0xff] %v651_v31 }
 0x15f   :  { %1053 = shalt.err (!%p1050_p6)
}
 0x160   :  { %s1054_s20 = scalar_lea.hbm %s1287_s4, 8192 }
 0x161   :  { %p1055_p7 = scmp.ne.s32.totalorder %s1287_s4, %s1054_s20  ;;  %p1058_p8 = scmp.lt.u32.totalorder %s1054_s20, %s1287_s4 }
 0x163   :  { %p1060_p9 = pnand %p1058_p8, %p1055_p7 }
 0x165   :  { %1063 = shalt.err (!%p1060_p9)
}
 0x166   :  { %728 = dma.vmem_to_hbm [thread:$0]  %s723_s3, 8192, %s1287_s4, [#allocation4], %s1071_s25, %s1071_s25, %s1072_s26  }
 0x167   :  { %1068 = dma.done.wait [#allocation4], 8192  }
 0x168   :  { %1069 = vsyncadd [#allocation4], 4294959104 }
 0x169   :  { %732 = vsyncpa [#allocation3], 1 }
 0x16a   :  { %733 = vsyncpa [#allocation6], 1 }
 0x16b   :  { %734 = vsyncpa [#allocation4], 1 }

</bundles_post_ra>
